<compile_context>
chip_gen: v5e
topology: v5e:2x2
jax: 0.10.0
libtpu: 0.0.40
codegen_flags: <defaults>
</compile_context>

<pallas_src>
import functools

import jax
import jax.numpy as jnp
from jax.experimental import pallas as pl
from jax.experimental.pallas import tpu as pltpu

_PAIRWISE_EPS = 1e-6  # matches torch.nn.functional.pairwise_distance default eps


def _round_up(x, m):
    return ((x + m - 1) // m) * m


def _tpu_budget_and_cores():
    """Generation-aware scoped-VMEM budget (bytes) and TensorCore count.

    Falls back to the most conservative assumptions (64 MiB VMEM, 2 cores —
    i.e. v7x-like) if the hardware query is unavailable; on single-core chips
    the forced batch split is at most one extra ~0.35 µs grid step.
    """
    vmem_capacity = 64 * 1024 * 1024
    num_cores = 2
    try:
        info = pltpu.get_tpu_info()
        cap = getattr(info, "vmem_capacity_bytes", None)
        if cap:
            vmem_capacity = int(cap)
        for name in ("num_cores", "core_count", "tensorcores_per_chip",
                     "num_tensorcores"):
            val = getattr(info, name, None)
            if val:
                num_cores = int(val)
                break
    except Exception:
        pass
    # ~3/4 of per-core VMEM: ≈48 MiB on v7x, ≈96 MiB on v5e/v6e.
    budget = (vmem_capacity * 3) // 4
    return int(budget), int(num_cores)


def _contrastive_loss_kernel(o1_ref, o2_ref, label_ref, margin_ref, partial_ref,
                             *, batch, block_rows):
    i = pl.program_id(0)

    o1 = o1_ref[...].astype(jnp.float32)          # (TB, D)
    o2 = o2_ref[...].astype(jnp.float32)          # (TB, D)
    label = label_ref[...].astype(jnp.float32)    # (TB, 1)
    margin = margin_ref[0, 0]                     # scalar from SMEM

    # F.pairwise_distance: ||x1 - x2 + eps||_2 along the last dim.
    diff = o1 - o2 + _PAIRWISE_EPS
    d2 = jnp.sum(diff * diff, axis=-1, keepdims=True)   # (TB, 1)  == dist^2
    dist = jnp.sqrt(d2)                                  # EUP sqrt

    # (1 - y) * d^2 + y * clamp(margin - d, 0)^2
    hinge = jnp.maximum(margin - dist, 0.0)
    per_row = (1.0 - label) * d2 + label * hinge * hinge  # (TB, 1)

    # Mask rows past the true batch size (ragged last tile); jnp.where keeps
    # garbage in padded rows from leaking into the sum.
    row_ids = jax.lax.broadcasted_iota(jnp.int32, (block_rows, 1), 0) + i * block_rows
    per_row = jnp.where(row_ids < batch, per_row, 0.0)

    partial = jnp.sum(per_row)
    partial_ref[...] = jnp.broadcast_to(partial, partial_ref.shape).astype(jnp.float32)


def contrastive_loss(output1, output2, margin, label, *, cast_inputs_to_bf16=False):
    """output1, output2: (B, D) f32/bf16; label: (B,); margin: scalar."""
    if cast_inputs_to_bf16:
        # Kernel upcasts to f32 and accumulates in f32; this just halves HBM
        # traffic on a strictly bandwidth-bound kernel (use if numerics allow).
        output1 = output1.astype(jnp.bfloat16)
        output2 = output2.astype(jnp.bfloat16)

    B, D = output1.shape
    itemsize = jnp.dtype(output1.dtype).itemsize

    vmem_budget, num_cores = _tpu_budget_and_cores()

    # Per-row VMEM cost of one grid step:
    #   2 inputs x 2 pipeline buffers x D x itemsize   (auto-pipelined tiles)
    # + ~3  x D x 4                                    (in-kernel f32 temps:
    #                                                   upcasts, diff, diff^2)
    bytes_per_row = 4 * D * itemsize + 3 * D * 4
    tb_cap = max(8, (vmem_budget // bytes_per_row) // 8 * 8)
    TB = int(min(2048, tb_cap, _round_up(B, 8)))
    G = -(-B // TB)  # number of batch tiles

    # On multi-TensorCore chips, guarantee at least 2 grid steps so the
    # "parallel" batch axis can shard across both cores.
    if num_cores >= 2 and G == 1 and B > 8:
        TB = int(_round_up(-(-B // 2), 8))
        G = -(-B // TB)

    label2d = jnp.asarray(label, jnp.float32).reshape(B, 1)
    margin2d = jnp.asarray(margin, jnp.float32).reshape(1, 1)

    cost = pl.CostEstimate(
        flops=3 * B * D,
        transcendentals=B,
        bytes_accessed=2 * B * D * itemsize + B * 4 + G * 8 * 128 * 4,
    )

    kernel = functools.partial(_contrastive_loss_kernel, batch=B, block_rows=TB)

    # NOTE: a third pipeline buffer (pl.Buffered(3)) on the input tiles is a
    # small optional win on v5e/v6e; omitted to keep the VMEM budget closing
    # on v7x with the larger TB.
    partials = pl.pallas_call(
        kernel,
        out_shape=jax.ShapeDtypeStruct((G, 8, 128), jnp.float32),
        grid=(G,),
        in_specs=[
            pl.BlockSpec((TB, D), lambda i: (i, 0)),                 # output1 tile
            pl.BlockSpec((TB, D), lambda i: (i, 0)),                 # output2 tile
            pl.BlockSpec((TB, 1), lambda i: (i, 0)),                 # label tile
            pl.BlockSpec(memory_space=pltpu.MemorySpace.SMEM),       # margin (1,1)
        ],
        out_specs=pl.BlockSpec((1, 8, 128), lambda i: (i, 0, 0)),    # per-tile partial
        compiler_params=pltpu.CompilerParams(
            dimension_semantics=("parallel",),
            vmem_limit_bytes=int(vmem_budget),
        ),
        cost_estimate=cost,
    )(output1, output2, label2d, margin2d)

    # Final reduction over the (tiny) per-tile partial sums in plain JAX.
    return jnp.sum(partials[:, 0, 0]) / B


def _reference(output1, output2, margin, label):
    diff = (output1.astype(jnp.float32) - output2.astype(jnp.float32)
            + _PAIRWISE_EPS)
    dist = jnp.sqrt(jnp.sum(diff * diff, axis=-1))
    hinge = jnp.maximum(margin - dist, 0.0)
    return jnp.mean((1.0 - label) * dist**2 + label * hinge**2)


if __name__ == "__main__":
    key = jax.random.PRNGKey(0)

    # Case 1: tiny shapes from the module spec.
    k1, k2, k3 = jax.random.split(key, 3)
    B, D = 8, 32
    output1 = jax.random.normal(k1, (B, D), dtype=jnp.float32)
    output2 = jax.random.normal(k2, (B, D), dtype=jnp.float32)
    label = jax.random.bernoulli(k3, 0.5, (B,)).astype(jnp.float32)
    margin = 1.0

    loss = contrastive_loss(output1, output2, margin, label)
    jax.block_until_ready(loss)
    ref = _reference(output1, output2, margin, label)
    assert jnp.allclose(loss, ref, rtol=2e-5, atol=1e-5), (loss, ref)

    # Case 2: ragged / multi-tile path (exercises masking and the G>=2 split).
    k4, k5, k6 = jax.random.split(k3, 3)
    B2, D2 = 200, 96
    o1b = jax.random.normal(k4, (B2, D2), dtype=jnp.float32)
    o2b = jax.random.normal(k5, (B2, D2), dtype=jnp.float32)
    lblb = jax.random.bernoulli(k6, 0.5, (B2,)).astype(jnp.float32)

    loss2 = contrastive_loss(o1b, o2b, 1.5, lblb)
    jax.block_until_ready(loss2)
    ref2 = _reference(o1b, o2b, 1.5, lblb)
    assert jnp.allclose(loss2, ref2, rtol=2e-5, atol=1e-5), (loss2, ref2)

    print("KERNEL_OK")
</pallas_src>

<mosaic_0001>
module attributes {stable_mosaic.version = 11 : i64} {
  func.func @_contrastive_loss_kernel(%arg0: i32, %arg1: memref<8x32xf32, #tpu.memory_space<vmem>>, %arg2: memref<8x32xf32, #tpu.memory_space<vmem>>, %arg3: memref<8x1xf32, #tpu.memory_space<vmem>>, %arg4: memref<1x1xf32, #tpu.memory_space<smem>>, %arg5: memref<1x8x128xf32, #tpu.memory_space<vmem>>) attributes {dimension_semantics = [#tpu.dimension_semantics<parallel>], iteration_bounds = array<i64: 1>, scalar_prefetch = 0 : i64, scratch_operands = 0 : i64, tpu.core_type = #tpu.core_type<tc>, window_params = [{transform_indices = @transform_0, window_bounds = array<i64: 8, 32>}, {transform_indices = @transform_1, window_bounds = array<i64: 8, 32>}, {transform_indices = @transform_2, window_bounds = array<i64: 8, 1>}, {transform_indices = @transform_3, window_bounds = array<i64: 1, 1>}, {transform_indices = @transform_4, window_bounds = array<i64: 1, 8, 128>}]} {
    %c0 = arith.constant 0 : index
    %c0_0 = arith.constant 0 : index
    %0 = vector.load %arg1[%c0, %c0_0] : memref<8x32xf32, #tpu.memory_space<vmem>>, vector<8x32xf32>
    %c0_1 = arith.constant 0 : index
    %c0_2 = arith.constant 0 : index
    %1 = vector.load %arg2[%c0_1, %c0_2] : memref<8x32xf32, #tpu.memory_space<vmem>>, vector<8x32xf32>
    %c0_3 = arith.constant 0 : index
    %c0_4 = arith.constant 0 : index
    %2 = vector.load %arg3[%c0_3, %c0_4] : memref<8x1xf32, #tpu.memory_space<vmem>>, vector<8x1xf32>
    %c0_5 = arith.constant 0 : index
    %c0_6 = arith.constant 0 : index
    %3 = memref.load %arg4[%c0_5, %c0_6] : memref<1x1xf32, #tpu.memory_space<smem>>
    %4 = arith.subf %0, %1 : vector<8x32xf32>
    %cst = arith.constant 9.99999997E-7 : f32
    %5 = vector.broadcast %cst : f32 to vector<8x32xf32>
    %6 = arith.addf %4, %5 : vector<8x32xf32>
    %7 = arith.mulf %6, %6 : vector<8x32xf32>
    %cst_7 = arith.constant dense<0.000000e+00> : vector<8xf32>
    %8 = vector.multi_reduction <add>, %7, %cst_7 [1] : vector<8x32xf32> to vector<8xf32>
    %9 = vector.shape_cast %8 : vector<8xf32> to vector<8x1xf32>
    %10 = math.sqrt %9 : vector<8x1xf32>
    %11 = vector.broadcast %3 : f32 to vector<8x1xf32>
    %12 = arith.subf %11, %10 : vector<8x1xf32>
    %cst_8 = arith.constant 0.000000e+00 : f32
    %13 = vector.broadcast %cst_8 : f32 to vector<8x1xf32>
    %14 = arith.maximumf %12, %13 : vector<8x1xf32>
    %cst_9 = arith.constant 1.000000e+00 : f32
    %15 = vector.broadcast %cst_9 : f32 to vector<8x1xf32>
    %16 = arith.subf %15, %2 : vector<8x1xf32>
    %17 = arith.mulf %16, %9 : vector<8x1xf32>
    %18 = arith.mulf %2, %14 : vector<8x1xf32>
    %19 = arith.mulf %18, %14 : vector<8x1xf32>
    %20 = arith.addf %17, %19 : vector<8x1xf32>
    %21 = tpu.iota {dimensions = array<i32: 0>} : vector<8x1xi32>
    %c8_i32 = arith.constant 8 : i32
    %22 = arith.muli %arg0, %c8_i32 : i32
    %23 = vector.broadcast %22 : i32 to vector<8x1xi32>
    %24 = arith.addi %21, %23 : vector<8x1xi32>
    %c8_i32_10 = arith.constant 8 : i32
    %25 = vector.broadcast %c8_i32_10 : i32 to vector<8x1xi32>
    %26 = arith.cmpi slt, %24, %25 : vector<8x1xi32>
    %cst_11 = arith.constant 0.000000e+00 : f32
    %27 = vector.broadcast %cst_11 : f32 to vector<8x1xf32>
    %28 = arith.select %26, %20, %27 : vector<8x1xi1>, vector<8x1xf32>
    %29 = vector.shape_cast %28 : vector<8x1xf32> to vector<1x8x1xf32>
    %cst_12 = arith.constant dense<0.000000e+00> : vector<1xf32>
    %30 = vector.multi_reduction <add>, %29, %cst_12 [1, 2] : vector<1x8x1xf32> to vector<1xf32>
    %31 = vector.shape_cast %30 : vector<1xf32> to vector<1x1x1xf32>
    %32 = vector.extract %31[0, 0, 0] : f32 from vector<1x1x1xf32>
    %33 = vector.broadcast %32 : f32 to vector<1x8x128xf32>
    %c0_13 = arith.constant 0 : index
    %c0_14 = arith.constant 0 : index
    %c0_15 = arith.constant 0 : index
    %34 = vector.load %arg5[%c0_13, %c0_14, %c0_15] : memref<1x8x128xf32, #tpu.memory_space<vmem>>, vector<1x8x128xf32>
    tpu.vector_store %arg5[%c0_13, %c0_14, %c0_15], %33 {strides = array<i32>} : memref<1x8x128xf32, #tpu.memory_space<vmem>>, vector<1x8x128xf32>,
    return
  }
  func.func @transform_0(%arg0: i32) -> (i32, i32) {
    %c0_i32 = arith.constant 0 : i32
    %c0_i32_0 = arith.constant 0 : i32
    return %arg0, %c0_i32 : i32, i32
  }
  func.func @transform_1(%arg0: i32) -> (i32, i32) {
    %c0_i32 = arith.constant 0 : i32
    %c0_i32_0 = arith.constant 0 : i32
    return %arg0, %c0_i32 : i32, i32
  }
  func.func @transform_2(%arg0: i32) -> (i32, i32) {
    %c0_i32 = arith.constant 0 : i32
    %c0_i32_0 = arith.constant 0 : i32
    return %arg0, %c0_i32 : i32, i32
  }
  func.func @transform_3(%arg0: i32) -> (i32, i32) {
    %c0_i32 = arith.constant 0 : i32
    %c0_i32_0 = arith.constant 0 : i32
    %c0_i32_1 = arith.constant 0 : i32
    return %c0_i32, %c0_i32_0 : i32, i32
  }
  func.func @transform_4(%arg0: i32) -> (i32, i32, i32) {
    %c0_i32 = arith.constant 0 : i32
    %c0_i32_0 = arith.constant 0 : i32
    %c0_i32_1 = arith.constant 0 : i32
    return %arg0, %c0_i32, %c0_i32_0 : i32, i32, i32
  }
}

</mosaic_0001>

<bundles_post_ra>
// kernel: tpu_custom_call.1
= control target key start
LH: loop header
LB: loop body
LE: loop exit
PB: predicated region body
PF: predicated region fallthrough
CT: control target
= control target key end

     0   :  { %10 = vsyncpa [#allocation4], 0  ;;  %s201_s0 = inlined_call_operand.vmem [shape: f32[8,32], index: 0, kind: input, shape index: {}]   ;;  %s202_s1 = inlined_call_operand.hbm [shape: f32[8,32], index: 1, kind: input, shape index: {}]   ;;  %s203_s2 = inlined_call_operand.vmem [shape: f32[8,1], index: 2, kind: input, shape index: {}]   ;;  %s204_s3 = inlined_call_operand.<no memory space> [shape: f32[1,1], index: 3, kind: input, shape index: {}]   ;;  %s205_s4 = inlined_call_operand.hbm [shape: f32[1,8,128], index: 4, kind: output, shape index: {}]  }
   0x1   :  { %11 = vsyncpa [#allocation5], 0  ;;  %s19_s17 = sshll.u32 %s202_s1, 4  ;;  %s159_s18 = smov [#allocation3]   ;;  %s20_s17 = int_to_ptr.hbm [resolvable:$true] %s19_s17 }
   0x2   :  { %s21_s19 = sshll.u32 %s159_s18, 4  ;;  %s22_s19 = int_to_ptr.vmem [resolvable:$true] %s21_s19 }
   0x3   :  { %24 = dma.hbm_to_vmem [thread:$0]  %s20_s17, 128, %s22_s19, [#allocation4]  }
   0x4   :  { %155 = dma.done.wait [#allocation4], 128  }
   0x5   :  { %156 = vsyncadd [#allocation4], 4294967168  ;;  %v33_v0 = vld [vmem:[%s201_s0] sm:$0xff]  ;;  %vm40_vm0 = vcmask 261120   ;;  %v56_v15 = vstv %s204_s3  ;;  %vm71_vm3 = vcmask 7168   ;;  %s91_s26 = sshll.u32 %s205_s4, 4  ;;  %s92_s26 = int_to_ptr.hbm [resolvable:$true] %s91_s26 }
   0x6   :  { %v34_v1 = vld [vmem:[#allocation3] sm:$0xff] }
   0x7   :  { %v37_v2 = vsub.f32 %v33_v0, %v34_v1  ;;  %v35_v17 = vld [vmem:[%s203_s2] sm:$0xff]  ;;  %s160_s2 = smov [#allocation6]  }
   0x8   :  { %v59_v21 = vsub.f32 1.0, %v35_v17  ;;  %s89_s3 = sshll.u32 %s160_s2, 4  ;;  %s90_s3 = int_to_ptr.vmem [resolvable:$true] %s89_s3 }
   0x9   :  { %v38_v3 = vadd.f32 1e-06, %v37_v2 }
   0xb   :  { %v39_v4 = vmul.f32 %v38_v3, %v38_v3 }
   0xd   :  { %v41_v5 = vsel %vm40_vm0, %v39_v4, 0.0 }
   0xe   :  { %42 = vadd.xlane.f32.xlu0 %v41_v5 }
  0x81   :  { %v43_v6 = vpop.xlane.xlu0 %42 }
  0x82   :  { %105 = vrsqrt.f32 %v43_v6  ;;  %vm51_vm1 = vcmp.eq.f32.partialorder %v43_v6, inf  ;;  %v54_v14 = vand.u32 2147483648, %v43_v6  ;;  %vm53_vm2 = vcmp.eq.f32.partialorder %v43_v6, 0.0 }
  0x83   :  { %v60_v23 = vmul.f32 %v59_v21, %v43_v6 }
  0x88   :  { %v106_v7 = vpop.eup %105 }
  0x89   :  { %v45_v8 = vmul.f32 %v106_v7, %v43_v6 }
  0x8b   :  { %v46_v9 = vmul.f32 %v106_v7, %v45_v8 }
  0x8d   :  { %v47_v10 = vmul.f32 0.5, %v46_v9 }
  0x8f   :  { %v48_v11 = vsub.f32 1.5, %v47_v10 }
  0x91   :  { %v49_v12 = vmul.f32 %v106_v7, %v48_v11 }
  0x93   :  { %v50_v13 = vmul.f32 %v49_v12, %v43_v6 }
  0x95   :  { %v52_v16 = vsel %vm51_vm1, %v43_v6, %v50_v13 }
  0x96   :  { %v55_v18 = vsel %vm53_vm2, %v54_v14, %v52_v16 }
  0x97   :  { %v57_v19 = vsub.f32 %v56_v15, %v55_v18 }
  0x99   :  { %v58_v20 = vmax.f32 %v57_v19, 0.0 }
  0x9b   :  { %v61_v22 = vmul.f32 %v58_v20, %v35_v17 }
  0x9d   :  { %v62_v24 = vmul.f32 %v61_v22, %v58_v20 }
  0x9f   :  { %v63_v25 = vadd.f32 %v62_v24, %v60_v23 }
  0xa1   :  { %v72_v26 = vsel %vm71_vm3, %v63_v25, 0.0 }
  0xa2   :  { %73 = vadd.xlane.f32.xlu0 %v72_v26 }
 0x115   :  { %v74_v27 = vpop.xlane.xlu0 %73 }
 0x116   :  { %v75_v28 = vrot.slane %v74_v27, 4 }
 0x118   :  { %v76_v29 = vadd.f32 %v75_v28, %v74_v27 }
 0x11a   :  { %v77_v30 = vrot.slane %v76_v29, 2 }
 0x11c   :  { %v78_v31 = vadd.f32 %v77_v30, %v76_v29 }
 0x11e   :  { %v79_v32 = vrot.slane %v78_v31, 1 }
 0x120   :  { %v80_v33 = vadd.f32 %v79_v32, %v78_v31 }
 0x122   :  { %101 = vpush %v80_v33 }
 0x153   :  { %s102_s27 = spop %101 }
 0x154   :  { %v82_v34 = vstv %s102_s27 }
 0x155   :  { %83 = vst [vmem:[#allocation6] sm:$0xff] %v82_v34 }
 0x156   :  { %94 = dma.vmem_to_hbm [thread:$0]  %s90_s3, 128, %s92_s26, [#allocation5]  }
 0x157   :  { %157 = dma.done.wait [#allocation5], 128  }
 0x158   :  { %158 = vsyncadd [#allocation5], 4294967168 }
 0x159   :  { %99 = vsyncpa [#allocation4], 1 }
 0x15a   :  { %100 = vsyncpa [#allocation5], 1 }

</bundles_post_ra>
